<compile_context>
chip_gen: v5e
topology: v5e:2x2
jax: 0.10.0
libtpu: 0.0.40
codegen_flags: <defaults>
</compile_context>

<pallas_src>
import functools

import jax
import jax.numpy as jnp
import numpy as np
from jax.experimental import pallas as pl
from jax.experimental.pallas import tpu as pltpu

_LANES = 128
_SUBLANES = 8


def _cdiv(a, b):
    return -(-a // b)


# --------------------------------------------------------------------------
# Kernels
# --------------------------------------------------------------------------
def _make_labelmix_label_kernel(n_cls):
    """One-hot / score-map label input: fused running-max argmax + bit pick."""

    def kernel(bits_ref,    # SMEM (n_cls,) int32  (scalar prefetch)
               label_ref,   # VMEM (1, C_cls, R_TILE, 128) f32
               fake_ref,    # VMEM (1, C_img, R_TILE, 128)
               real_ref,    # VMEM (1, C_img, R_TILE, 128)
               mixed_ref,   # VMEM (1, C_img, R_TILE, 128) out
               mask_ref):   # VMEM (1, 1,     R_TILE, 128) f32 out
        run_max = label_ref[0, 0]                                 # (R,128)
        run_bit = jnp.full(run_max.shape, bits_ref[0].astype(jnp.float32),
                           dtype=jnp.float32)
        # strict '>' keeps first-occurrence argmax semantics (torch.argmax)
        for c in range(1, n_cls):
            lab_c = label_ref[0, c]
            b_c = bits_ref[c].astype(jnp.float32)
            run_bit = jnp.where(lab_c > run_max, b_c, run_bit)
            run_max = jnp.maximum(run_max, lab_c)

        take_real = run_bit > 0.5                                 # {0,1} exact
        mixed_ref[0] = jnp.where(take_real[None, :, :], real_ref[0], fake_ref[0])
        mask_ref[0, 0] = run_bit

    return kernel


def _make_labelmix_idx_kernel(n_words):
    """Integer class-map input: O(C/32) packed-bit lookup (shift + mask)."""

    def kernel(packed_ref,  # SMEM (n_words,) int32 (scalar prefetch)
               idx_ref,     # VMEM (1, 1, R_TILE, 128) int32
               fake_ref,    # VMEM (1, C_img, R_TILE, 128)
               real_ref,    # VMEM (1, C_img, R_TILE, 128)
               mixed_ref,   # VMEM (1, C_img, R_TILE, 128) out
               mask_ref):   # VMEM (1, 1,     R_TILE, 128) f32 out
        idx = idx_ref[0, 0]                                       # (R,128) i32
        w_id = idx >> 5
        word = jnp.zeros(idx.shape, jnp.int32)
        for w in range(n_words):                                  # tiny unroll
            word = jnp.where(w_id == w, packed_ref[w], word)
        bit = (word >> (idx & 31)) & 1                            # {0,1}

        take_real = bit != 0
        mixed_ref[0] = jnp.where(take_real[None, :, :], real_ref[0], fake_ref[0])
        mask_ref[0, 0] = bit.astype(mask_ref.dtype)

    return kernel


# --------------------------------------------------------------------------
# Tiling / layout helpers
# --------------------------------------------------------------------------
def _vmem_limit_bytes():
    """Generation-aware VMEM limit: ~cap/2, never above cap-16MiB."""
    cap = 64 * 1024 * 1024                       # conservative (v7x) fallback
    try:
        cap = int(pltpu.get_tpu_info().vmem_capacity_bytes)
    except Exception:
        pass
    return int(max(32 * 1024 * 1024, min(cap // 2, cap - 16 * 1024 * 1024)))


def _choose_r_tile(r_needed, batch, n_chan, vmem_limit):
    """Pick the sublane-row tile (multiple of 8) for the (B,C,R,128) layout.

    n_chan counts every f32/int32 channel touched per pixel (inputs+outputs);
    blocks are exactly dense so the VMEM math is exact.
    """
    row_bytes_vmem = n_chan * _LANES * 4 * 2     # double-buffered blocks
    row_bytes_hbm = n_chan * _LANES * 4
    max_by_vmem = (vmem_limit // 2) // row_bytes_vmem   # headroom for scratch
    max_by_traffic = (8 * 1024 * 1024) // row_bytes_hbm  # ~8 MiB HBM / step
    r_tile = max(_SUBLANES, min(max_by_vmem, max_by_traffic))
    r_tile = max(_SUBLANES, (r_tile // _SUBLANES) * _SUBLANES)

    r_ceil = max(_SUBLANES, _cdiv(r_needed, _SUBLANES) * _SUBLANES)
    r_tile = min(r_tile, r_ceil)
    # keep >= 2 parallel blocks so both v7x TensorCores get work
    while batch * _cdiv(r_ceil, r_tile) < 2 and r_tile > _SUBLANES:
        r_tile = max(_SUBLANES, (r_tile // 2 // _SUBLANES) * _SUBLANES)
    return r_tile


def _to_tiles(x, r_pad):
    """(B, C, H, W) -> zero-padded, lane-dense (B, C, r_pad, 128)."""
    b, c = x.shape[0], x.shape[1]
    hw = x.shape[2] * x.shape[3]
    x = x.reshape(b, c, hw)
    hw_pad = r_pad * _LANES
    if hw_pad != hw:
        x = jnp.pad(x, ((0, 0), (0, 0), (0, hw_pad - hw)))
    return x.reshape(b, c, r_pad, _LANES)


# --------------------------------------------------------------------------
# generate_labelmix
# --------------------------------------------------------------------------
@functools.partial(jax.jit, static_argnames=("one_hot_label",))
def generate_labelmix(label, fake_image, real_image, key, class_map=None,
                      one_hot_label=True):
    """Pallas version of models_EPE.generate_labelmix.

    label:      (B, C_cls, H, W) float32 (one-hot / score map)
    fake_image: (B, C_img, H, W)
    real_image: (B, C_img, H, W)
    class_map:  optional (B, H, W) or (B, 1, H, W) int class index map; when
                given the kernel skips the C_cls-channel label read entirely.
    returns (mixed_image (B, C_img, H, W), target_map (B, 1, H, W))
    """
    B, C_cls, H, W = label.shape
    C_img = fake_image.shape[1]
    HW = H * W
    use_idx = class_map is not None

    # Per-class random bits.  (torch draws one per *present* class from its
    # own RNG stream; we draw C_cls bits up front -- documented deviation.)
    bits = jax.random.randint(key, (C_cls,), 0, 2, dtype=jnp.int32)

    # Replicate the sequential in-place assignment quirk of the reference:
    # class-0 pixels set to 1 are re-assigned class-1's bit when class 1 is
    # present anywhere in the batch.
    if C_cls > 1:
        if use_idx:
            present1 = jnp.any(class_map == 1)
        elif one_hot_label:
            present1 = jnp.any(label[:, 1] > 0)        # single channel read
        else:
            present1 = jnp.any(jnp.argmax(label, axis=1) == 1)
        bits = bits.at[0].set(
            jnp.where((bits[0] == 1) & present1, bits[1], bits[0]))

    # ---- layout / tile selection -----------------------------------------
    n_chan = (1 if use_idx else C_cls) + 3 * C_img + 1   # in + out channels
    vmem_limit = _vmem_limit_bytes()
    r_needed = _cdiv(HW, _LANES)
    r_tile = _choose_r_tile(r_needed, B, n_chan, vmem_limit)
    r_pad = _cdiv(r_needed, r_tile) * r_tile
    grid = (B, r_pad // r_tile)

    fake4 = _to_tiles(fake_image, r_pad)
    real4 = _to_tiles(real_image, r_pad)

    img_spec = pl.BlockSpec((1, C_img, r_tile, _LANES),
                            lambda b, t, s: (b, 0, t, 0))
    mask_spec = pl.BlockSpec((1, 1, r_tile, _LANES),
                             lambda b, t, s: (b, 0, t, 0))

    if use_idx:
        idx4 = _to_tiles(class_map.reshape(B, 1, H, W).astype(jnp.int32), r_pad)
        n_words = (C_cls + 31) // 32
        cls_ids = jnp.arange(C_cls, dtype=jnp.int32)
        packed = jnp.zeros((n_words,), jnp.int32).at[cls_ids >> 5].add(
            bits << (cls_ids & 31))
        kernel = _make_labelmix_idx_kernel(n_words)
        prefetch, first_in = packed, idx4
        first_spec = pl.BlockSpec((1, 1, r_tile, _LANES),
                                  lambda b, t, s: (b, 0, t, 0))
    else:
        lab4 = _to_tiles(label, r_pad)
        kernel = _make_labelmix_label_kernel(C_cls)
        prefetch, first_in = bits, lab4
        first_spec = pl.BlockSpec((1, C_cls, r_tile, _LANES),
                                  lambda b, t, s: (b, 0, t, 0))

    mixed4, mask4 = pl.pallas_call(
        kernel,
        out_shape=(
            jax.ShapeDtypeStruct((B, C_img, r_pad, _LANES), fake_image.dtype),
            jax.ShapeDtypeStruct((B, 1, r_pad, _LANES), jnp.float32),
        ),
        grid_spec=pltpu.PrefetchScalarGridSpec(
            num_scalar_prefetch=1,
            grid=grid,
            in_specs=[first_spec, img_spec, img_spec],
            out_specs=[img_spec, mask_spec],
        ),
        compiler_params=pltpu.CompilerParams(
            dimension_semantics=("parallel", "parallel"),
            vmem_limit_bytes=vmem_limit),
    )(prefetch, first_in, fake4, real4)

    mixed = mixed4.reshape(B, C_img, r_pad * _LANES)[:, :, :HW]
    mask = mask4.reshape(B, 1, r_pad * _LANES)[:, :, :HW]
    return mixed.reshape(B, C_img, H, W), mask.reshape(B, 1, H, W)


class OASIS_model:
    """Minimal JAX/Pallas stand-in for models_EPE.OASIS_model.

    Only the labelmix path of the forward (mode='losses_D') is implementable
    without the external generator/discriminator/loss definitions.
    """

    def __init__(self):
        # TODO(synk): netG / netD / netEMA / VGG loss (generators.*,
        # discriminators.*, losses.*) are not defined in the reference source.
        self.coords = None
        self.latent = None

    def labelmix(self, label, fake, real, key, class_map=None):
        return generate_labelmix(label, fake, real, key, class_map=class_map)


if __name__ == "__main__":
    key = jax.random.PRNGKey(0)
    k_lab, k_fake, k_real, k_bits = jax.random.split(key, 4)

    B, C_cls, C_img, H, W = 2, 4, 3, 16, 16

    # one-hot semantic label map (the OASIS case)
    class_map = jax.random.randint(k_lab, (B, H, W), 0, C_cls)
    label = jax.nn.one_hot(class_map, C_cls, axis=1, dtype=jnp.float32)
    fake = jax.random.normal(k_fake, (B, C_img, H, W), dtype=jnp.float32)
    real = jax.random.normal(k_real, (B, C_img, H, W), dtype=jnp.float32)

    model = OASIS_model()

    # path 1: one-hot label input (matches the torch call signature)
    mixed, mask = model.labelmix(label, fake, real, k_bits)
    mixed = jax.block_until_ready(mixed)
    mask = jax.block_until_ready(mask)

    # path 2: integer class-map fast path (eliminates the label HBM read)
    mixed_i, mask_i = model.labelmix(label, fake, real, k_bits,
                                     class_map=class_map)
    mixed_i = jax.block_until_ready(mixed_i)
    mask_i = jax.block_until_ready(mask_i)

    # pure-JAX reference with the same deterministic per-class bits
    bits = jax.random.randint(k_bits, (C_cls,), 0, 2, dtype=jnp.int32)
    present1 = jnp.any(class_map == 1)
    bits = bits.at[0].set(jnp.where((bits[0] == 1) & present1, bits[1], bits[0]))
    idx = jnp.argmax(label, axis=1, keepdims=True)            # (B,1,H,W)
    mask_ref = bits[idx].astype(jnp.float32)                  # (B,1,H,W)
    mixed_ref = mask_ref * real + (1.0 - mask_ref) * fake

    for m_out, x_out in ((mask, mixed), (mask_i, mixed_i)):
        assert x_out.shape == (B, C_img, H, W) and m_out.shape == (B, 1, H, W)
        np.testing.assert_allclose(np.asarray(m_out), np.asarray(mask_ref),
                                   rtol=0, atol=0)
        np.testing.assert_allclose(np.asarray(x_out), np.asarray(mixed_ref),
                                   rtol=1e-6, atol=1e-6)
    print("KERNEL_OK")
</pallas_src>

<mosaic_0001>
module attributes {stable_mosaic.version = 11 : i64} {
  func.func @kernel(%arg0: i32, %arg1: i32, %arg2: memref<4xi32, #tpu.memory_space<smem>>, %arg3: memref<1x4x8x128xf32, #tpu.memory_space<vmem>>, %arg4: memref<1x3x8x128xf32, #tpu.memory_space<vmem>>, %arg5: memref<1x3x8x128xf32, #tpu.memory_space<vmem>>, %arg6: memref<1x3x8x128xf32, #tpu.memory_space<vmem>>, %arg7: memref<1x1x8x128xf32, #tpu.memory_space<vmem>>) attributes {dimension_semantics = [#tpu.dimension_semantics<parallel>, #tpu.dimension_semantics<parallel>], iteration_bounds = array<i64: 2, 1>, scalar_prefetch = 1 : i64, scratch_operands = 0 : i64, tpu.core_type = #tpu.core_type<tc>, window_params = [{transform_indices = @transform_0, window_bounds = array<i64: 1, 4, 8, 128>}, {transform_indices = @transform_1, window_bounds = array<i64: 1, 3, 8, 128>}, {transform_indices = @transform_2, window_bounds = array<i64: 1, 3, 8, 128>}, {transform_indices = @transform_3, window_bounds = array<i64: 1, 3, 8, 128>}, {transform_indices = @transform_4, window_bounds = array<i64: 1, 1, 8, 128>}]} {
    %c0 = arith.constant 0 : index
    %c0_0 = arith.constant 0 : index
    %c0_1 = arith.constant 0 : index
    %c0_2 = arith.constant 0 : index
    %0 = vector.load %arg3[%c0, %c0_0, %c0_1, %c0_2] : memref<1x4x8x128xf32, #tpu.memory_space<vmem>>, vector<1x1x8x128xf32>
    %1 = vector.shape_cast %0 : vector<1x1x8x128xf32> to vector<8x128xf32>
    %c0_3 = arith.constant 0 : index
    %2 = memref.load %arg2[%c0_3] : memref<4xi32, #tpu.memory_space<smem>>
    %3 = arith.sitofp %2 : i32 to f32
    %4 = vector.broadcast %3 : f32 to vector<8x128xf32>
    %c0_4 = arith.constant 0 : index
    %c1 = arith.constant 1 : index
    %c0_5 = arith.constant 0 : index
    %c0_6 = arith.constant 0 : index
    %5 = vector.load %arg3[%c0_4, %c1, %c0_5, %c0_6] : memref<1x4x8x128xf32, #tpu.memory_space<vmem>>, vector<1x1x8x128xf32>
    %6 = vector.shape_cast %5 : vector<1x1x8x128xf32> to vector<8x128xf32>
    %c1_7 = arith.constant 1 : index
    %7 = memref.load %arg2[%c1_7] : memref<4xi32, #tpu.memory_space<smem>>
    %8 = arith.sitofp %7 : i32 to f32
    %9 = arith.cmpf ogt, %6, %1 : vector<8x128xf32>
    %10 = vector.broadcast %8 : f32 to vector<8x128xf32>
    %11 = arith.select %9, %10, %4 : vector<8x128xi1>, vector<8x128xf32>
    %12 = arith.maximumf %1, %6 : vector<8x128xf32>
    %c0_8 = arith.constant 0 : index
    %c2 = arith.constant 2 : index
    %c0_9 = arith.constant 0 : index
    %c0_10 = arith.constant 0 : index
    %13 = vector.load %arg3[%c0_8, %c2, %c0_9, %c0_10] : memref<1x4x8x128xf32, #tpu.memory_space<vmem>>, vector<1x1x8x128xf32>
    %14 = vector.shape_cast %13 : vector<1x1x8x128xf32> to vector<8x128xf32>
    %c2_11 = arith.constant 2 : index
    %15 = memref.load %arg2[%c2_11] : memref<4xi32, #tpu.memory_space<smem>>
    %16 = arith.sitofp %15 : i32 to f32
    %17 = arith.cmpf ogt, %14, %12 : vector<8x128xf32>
    %18 = vector.broadcast %16 : f32 to vector<8x128xf32>
    %19 = arith.select %17, %18, %11 : vector<8x128xi1>, vector<8x128xf32>
    %20 = arith.maximumf %12, %14 : vector<8x128xf32>
    %c0_12 = arith.constant 0 : index
    %c3 = arith.constant 3 : index
    %c0_13 = arith.constant 0 : index
    %c0_14 = arith.constant 0 : index
    %21 = vector.load %arg3[%c0_12, %c3, %c0_13, %c0_14] : memref<1x4x8x128xf32, #tpu.memory_space<vmem>>, vector<1x1x8x128xf32>
    %22 = vector.shape_cast %21 : vector<1x1x8x128xf32> to vector<8x128xf32>
    %c3_15 = arith.constant 3 : index
    %23 = memref.load %arg2[%c3_15] : memref<4xi32, #tpu.memory_space<smem>>
    %24 = arith.sitofp %23 : i32 to f32
    %25 = arith.cmpf ogt, %22, %20 : vector<8x128xf32>
    %26 = vector.broadcast %24 : f32 to vector<8x128xf32>
    %27 = arith.select %25, %26, %19 : vector<8x128xi1>, vector<8x128xf32>
    %cst = arith.constant 5.000000e-01 : f32
    %28 = vector.broadcast %cst : f32 to vector<8x128xf32>
    %29 = arith.cmpf ogt, %27, %28 : vector<8x128xf32>
    %30 = vector.shape_cast %29 : vector<8x128xi1> to vector<1x8x128xi1>
    %c0_16 = arith.constant 0 : index
    %c0_17 = arith.constant 0 : index
    %c0_18 = arith.constant 0 : index
    %c0_19 = arith.constant 0 : index
    %31 = vector.load %arg5[%c0_16, %c0_17, %c0_18, %c0_19] : memref<1x3x8x128xf32, #tpu.memory_space<vmem>>, vector<1x3x8x128xf32>
    %32 = vector.shape_cast %31 : vector<1x3x8x128xf32> to vector<3x8x128xf32>
    %c0_20 = arith.constant 0 : index
    %c0_21 = arith.constant 0 : index
    %c0_22 = arith.constant 0 : index
    %c0_23 = arith.constant 0 : index
    %33 = vector.load %arg4[%c0_20, %c0_21, %c0_22, %c0_23] : memref<1x3x8x128xf32, #tpu.memory_space<vmem>>, vector<1x3x8x128xf32>
    %34 = vector.shape_cast %33 : vector<1x3x8x128xf32> to vector<3x8x128xf32>
    %35 = vector.shape_cast %30 : vector<1x8x128xi1> to vector<1x8x128xi1>
    %36 = vector.broadcast %35 : vector<1x8x128xi1> to vector<3x8x128xi1>
    %37 = arith.select %36, %32, %34 : vector<3x8x128xi1>, vector<3x8x128xf32>
    %c0_24 = arith.constant 0 : index
    %c0_25 = arith.constant 0 : index
    %c0_26 = arith.constant 0 : index
    %c0_27 = arith.constant 0 : index
    %38 = vector.load %arg6[%c0_24, %c0_25, %c0_26, %c0_27] : memref<1x3x8x128xf32, #tpu.memory_space<vmem>>, vector<1x3x8x128xf32>
    %39 = vector.shape_cast %38 : vector<1x3x8x128xf32> to vector<3x8x128xf32>
    %40 = vector.shape_cast %37 : vector<3x8x128xf32> to vector<1x3x8x128xf32>
    tpu.vector_store %arg6[%c0_24, %c0_25, %c0_26, %c0_27], %40 {strides = array<i32>} : memref<1x3x8x128xf32, #tpu.memory_space<vmem>>, vector<1x3x8x128xf32>,
    %c0_28 = arith.constant 0 : index
    %c0_29 = arith.constant 0 : index
    %c0_30 = arith.constant 0 : index
    %c0_31 = arith.constant 0 : index
    %41 = vector.load %arg7[%c0_28, %c0_29, %c0_30, %c0_31] : memref<1x1x8x128xf32, #tpu.memory_space<vmem>>, vector<1x1x8x128xf32>
    %42 = vector.shape_cast %41 : vector<1x1x8x128xf32> to vector<8x128xf32>
    %43 = vector.shape_cast %27 : vector<8x128xf32> to vector<1x1x8x128xf32>
    tpu.vector_store %arg7[%c0_28, %c0_29, %c0_30, %c0_31], %43 {strides = array<i32>} : memref<1x1x8x128xf32, #tpu.memory_space<vmem>>, vector<1x1x8x128xf32>,
    return
  }
  func.func @transform_0(%arg0: i32, %arg1: i32, %arg2: memref<4xi32, #tpu.memory_space<smem>>) -> (i32, i32, i32, i32) {
    %c0_i32 = arith.constant 0 : i32
    %c0_i32_0 = arith.constant 0 : i32
    %c0_i32_1 = arith.constant 0 : i32
    return %arg0, %c0_i32, %arg1, %c0_i32_0 : i32, i32, i32, i32
  }
  func.func @transform_1(%arg0: i32, %arg1: i32, %arg2: memref<4xi32, #tpu.memory_space<smem>>) -> (i32, i32, i32, i32) {
    %c0_i32 = arith.constant 0 : i32
    %c0_i32_0 = arith.constant 0 : i32
    %c0_i32_1 = arith.constant 0 : i32
    return %arg0, %c0_i32, %arg1, %c0_i32_0 : i32, i32, i32, i32
  }
  func.func @transform_2(%arg0: i32, %arg1: i32, %arg2: memref<4xi32, #tpu.memory_space<smem>>) -> (i32, i32, i32, i32) {
    %c0_i32 = arith.constant 0 : i32
    %c0_i32_0 = arith.constant 0 : i32
    %c0_i32_1 = arith.constant 0 : i32
    return %arg0, %c0_i32, %arg1, %c0_i32_0 : i32, i32, i32, i32
  }
  func.func @transform_3(%arg0: i32, %arg1: i32, %arg2: memref<4xi32, #tpu.memory_space<smem>>) -> (i32, i32, i32, i32) {
    %c0_i32 = arith.constant 0 : i32
    %c0_i32_0 = arith.constant 0 : i32
    %c0_i32_1 = arith.constant 0 : i32
    return %arg0, %c0_i32, %arg1, %c0_i32_0 : i32, i32, i32, i32
  }
  func.func @transform_4(%arg0: i32, %arg1: i32, %arg2: memref<4xi32, #tpu.memory_space<smem>>) -> (i32, i32, i32, i32) {
    %c0_i32 = arith.constant 0 : i32
    %c0_i32_0 = arith.constant 0 : i32
    %c0_i32_1 = arith.constant 0 : i32
    return %arg0, %c0_i32, %arg1, %c0_i32_0 : i32, i32, i32, i32
  }
}

</mosaic_0001>

<bundles_post_ra>
// kernel: generate_labelmix.1
= control target key start
LH: loop header
LB: loop body
LE: loop exit
PB: predicated region body
PF: predicated region fallthrough
CT: control target
= control target key end

     0   :  { %s606_s21 = smov [#allocation3]   ;;  %s692_s0 = inlined_call_operand.vmem [shape: s32[4], index: 0, kind: input, shape index: {}]   ;;  %s693_s1 = inlined_call_operand.vmem [shape: f32[2,4,8,128], index: 1, kind: input, shape index: {}]   ;;  %s694_s2 = inlined_call_operand.vmem [shape: f32[2,3,8,128], index: 2, kind: input, shape index: {}]   ;;  %s695_s3 = inlined_call_operand.vmem [shape: f32[2,3,8,128], index: 3, kind: input, shape index: {}]   ;;  %s696_s4 = inlined_call_operand.vmem [shape: f32[2,3,8,128], index: 4, kind: output, shape index: {0}]   ;;  %s697_s5 = inlined_call_operand.vmem [shape: f32[2,1,8,128], index: 5, kind: output, shape index: {1}]  }
   0x1   :  { %s12_s20 = sshll.u32 %s692_s0, 4  ;;  %s13_s20 = int_to_ptr.vmem [resolvable:$true] %s12_s20 }
   0x2   :  { %15 = dma.vmem_to_smem %s13_s20, 16, %s606_s21, [#allocation2] }
   0x3   :  { %592 = dma.done.wait [#allocation2], 16 }
   0x4   :  { %593 = vsyncadd [#allocation2], 4294967280 }
   0x5   :  { %18 = sfence }
   0x6   :  { %s640_s22 = smov 0   ;;  %s642_s23 = smov 0  }
   0x7   :  { %s644_s24 = smov 0  }
   0x8 LB: > { %s36_s0 = sadd.s32 1, %s600_s23  ;;  %p526_p0 = scmp.ge.s32.totalorder %s604_s24, 1  ;;  %s604_s24 = sphi %s644_s24, %s24_s24   ;;  %s600_s23 = sphi %s642_s23, %s699_s23   ;;  %s596_s22 = sphi %s640_s22, %s698_s22  }
   0x9   : > { %p38_p1 = scmp.ge.s32.totalorder %s36_s0, 2  ;;  %p225_p2 = scmp.lt.s32.totalorder %s604_s24, 3 }
   0xb   : > { %s701_s0 = smov (%p38_p1, %s36_s0), 0  ;;  %p226_p3 = pnand %p526_p0, %p225_p2 }
   0xc   : > { %p280_p4 = scmp.lt.s32.totalorder (!%p226_p3), %s596_s22, 1  ;;  %s320_s25 = sld [smem:[#allocation3]] (!%p226_p3) }
   0xd   : > { %229 = sbr.rel (%p226_p3) target bundleno = 33 (0x21), region = 32  ;;  %s534_s26 = sld [smem:[#allocation3 + $0x1]] (!%p226_p3) }
   0xe   : > { %s536_s27 = sld [smem:[#allocation3 + $0x2]] (!%p226_p3) }
   0xf   : > { %s538_s8 = sld [smem:[#allocation3 + $0x3]] (!%p226_p3) }
  0x12   : > { %s703_s22 = smov (!%p280_p4, %s596_s22), 1  ;;  %s321_s12 = scvt.s32.f32 %s320_s25 }
  0x13   : > { %s541_s28 = sshll.u32 %s703_s22, 5  ;;  %s662_s29 = smul.u32 24, %s703_s22 }
  0x14   : > { %s287_s7 = scalar_lea.vmem %s693_s1, %s541_s28  ;;  %s326_s16 = scvt.s32.f32 %s534_s26  ;;  %v322_v5 = vstv %s321_s12 }
  0x15   : > { %v319_v0 = vld [vmem:[%s287_s7] sm:$0xff]  ;;  %v533_v1 = vld [vmem:[%s287_s7 + $0x8] sm:$0xff]  ;;  %v535_v2 = vld [vmem:[%s287_s7 + $0x10] sm:$0xff]  ;;  %s295_s11 = scalar_lea.vmem %s694_s2, %s662_s29  ;;  %s303_s15 = scalar_lea.vmem %s695_s3, %s662_s29 }
  0x16   : > { %v330_v3 = vmax.f32 %v319_v0, %v533_v1  ;;  %vm327_vm0 = vcmp.gt.f32.partialorder %v533_v1, %v319_v0  ;;  %v537_v4 = vld [vmem:[%s287_s7 + $0x18] sm:$0xff]  ;;  %s334_s17 = scvt.s32.f32 %s536_s27  ;;  %s532_s18 = sshll.u32 %s703_s22, 3  ;;  %v328_v7 = vstv %s326_s16  ;;  %v347_v11 = vld [vmem:[%s303_s15] sm:$0xff]  ;;  %v348_v13 = vld [vmem:[%s303_s15 + $0x8] sm:$0xff] }
  0x17   : > { %v329_v8 = vsel %vm327_vm0, %v328_v7, %v322_v5  ;;  %s342_s19 = scvt.s32.f32 %s538_s8  ;;  %v350_v12 = vld [vmem:[%s295_s11] sm:$0xff]  ;;  %s318_s25 = scalar_lea.vmem %s697_s5, %s532_s18  ;;  %v351_v15 = vld [vmem:[%s295_s11 + $0x8] sm:$0xff]  ;;  %v349_v16 = vld [vmem:[%s303_s15 + $0x10] sm:$0xff] }
  0x18   : > { %vm335_vm1 = vcmp.gt.f32.partialorder %v535_v2, %v330_v3  ;;  %v338_v6 = vmax.f32 %v330_v3, %v535_v2  ;;  %v336_v9 = vstv %s334_s17  ;;  %v352_v17 = vld [vmem:[%s295_s11 + $0x10] sm:$0xff]  ;;  %s311_s22 = scalar_lea.vmem %s696_s4, %s662_s29 }
  0x19   : > { %v337_v10 = vsel %vm335_vm1, %v336_v9, %v329_v8  ;;  %v344_v14 = vstv %s342_s19 }
  0x1a   : > { %vm343_vm2 = vcmp.gt.f32.partialorder %v537_v4, %v338_v6 }
  0x1b   : > { %v345_v18 = vsel %vm343_vm2, %v344_v14, %v337_v10 }
  0x1c   : > { %vm346_vm3 = vcmp.gt.f32.partialorder %v345_v18, 0.5  ;;  %361 = vst [vmem:[%s318_s25] sm:$0xff] %v345_v18 }
  0x1d   : > { %v355_v19 = vsel %vm346_vm3, %v347_v11, %v350_v12  ;;  %v356_v20 = vsel %vm346_vm3, %v348_v13, %v351_v15  ;;  %v357_v21 = vsel %vm346_vm3, %v349_v16, %v352_v17 }
  0x1e   : > { %358 = vst [vmem:[%s311_s22] sm:$0xff] %v355_v19 }
  0x1f   : > { %359 = vst [vmem:[%s311_s22 + $0x8] sm:$0xff] %v356_v20 }
  0x20   : > { %360 = vst [vmem:[%s311_s22 + $0x10] sm:$0xff] %v357_v21 }
  0x21 PF: > { %s24_s24 = sadd.s32 1, %s604_s24   ;;  %s698_s22 = smov %s600_s23 }
  0x22   : > { %p21_p5 = scmp.ge.s32.totalorder %s24_s24, 4   ;;  %s699_s23 = smov %s701_s0 }
  0x24   :  { %23 = sbr.rel (!%p21_p5) target bundleno = 8 (0x8), region = 83 }

</bundles_post_ra>
